<compile_context>
chip_gen: v6e
topology: v6e:2x2x1
jax: 0.10.0
libtpu: 0.0.40
codegen_flags: <defaults>
</compile_context>

<pallas_src>
import functools

import jax
import jax.numpy as jnp
from jax.experimental import pallas as pl
from jax.experimental.pallas import tpu as pltpu


# ---------------------------------------------------------------------------
# Generation-aware budgets (v5e/v6e: 128 MiB VMEM, v7x: 64 MiB per core).
# ---------------------------------------------------------------------------

@functools.lru_cache(maxsize=1)
def _budgets():
    phys_vmem = 64 * 1024 * 1024                 # conservative default (v7x-sized)
    try:
        phys_vmem = int(pltpu.get_tpu_info().vmem_capacity_bytes)
    except Exception:
        pass
    # ~75% of physical, capped: 96 MiB on 128-MiB chips, 48 MiB on v7x.
    vmem_limit = max(min((phys_vmem * 3) // 4, 100 * 1024 * 1024), 32 * 1024 * 1024)
    # Fused path holds ~4x slab (in + out, double-buffered) + tiny weights.
    fused_gate = vmem_limit // 5
    # Tiled path (excite) holds ~4x block; /12 leaves generous headroom.
    tile_target = vmem_limit // 12
    return vmem_limit, fused_gate, tile_target


def _pick_spatial_tile(hw, c, itemsize, target_bytes):
    """Largest 128-multiple spatial tile whose (C, tile) slab fits the target."""
    hw_pad = -(-hw // 128) * 128
    t = max((target_bytes // (c * itemsize)) // 128 * 128, 128)
    t = min(t, hw_pad)
    # Prefer an exact 128-multiple divisor of hw near the target (avoids the
    # masked tail tile and its wasted DMA) when one exists.
    if hw % 128 == 0:
        best = 0
        for k in range(1, hw // 128 + 1):
            d = 128 * k
            if d > t:
                break
            if hw % d == 0:
                best = d
        if best >= max(t // 2, 128):
            return int(best)
    return int(t)


# ---------------------------------------------------------------------------
# Kernels
# ---------------------------------------------------------------------------

def _pool_kernel(x_ref, part_ref, acc_ref, *, hw, tile, s_pp, s_total,
                 needs_mask, n_chunks, unroll):
    """Spatially-tiled global sum into per-(image, part) (C, 1) partials.

    Accumulates 128-lane chunks with VPU adds into a (C, 128) f32 scratch; the
    single cross-lane (XLU) reduce happens only at the last tile of each part.
    """
    p = pl.program_id(1)
    s = pl.program_id(2)
    tile_idx = p * s_pp + s

    @pl.when(s == 0)
    def _():
        acc_ref[...] = jnp.zeros_like(acc_ref)

    if needs_mask:
        lane = jax.lax.broadcasted_iota(jnp.int32, (1, 128), 1)
        col0 = tile_idx * tile

    def accumulate(masked):
        def body(k, carry):
            off = pl.multiple_of(k * 128, 128)
            chunk = x_ref[0, :, pl.ds(off, 128)].astype(jnp.float32)
            if masked:
                chunk = jnp.where(col0 + off + lane < hw, chunk, 0.0)
            acc_ref[...] += chunk
            return carry
        jax.lax.fori_loop(0, n_chunks, body, 0, unroll=unroll)

    if needs_mask:
        # Only the last spatial tile of the image has out-of-range columns.
        @pl.when(tile_idx == s_total - 1)
        def _():
            accumulate(True)

        @pl.when(tile_idx != s_total - 1)
        def _():
            accumulate(False)
    else:
        accumulate(False)

    @pl.when(s == s_pp - 1)
    def _():
        part_ref[0, 0] = jnp.sum(acc_ref[...], axis=1, keepdims=True)


def _excite_kernel(part_ref, w1t_ref, b1_ref, w2_ref, b2_ref, x_ref, o_ref,
                   *, inv_hw, parts):
    """Combine partial sums, apply FC->ReLU->FC->Sigmoid, broadcast-multiply."""
    psum = part_ref[0, 0]                                            # (C, 1) f32
    for p in range(1, parts):
        psum = psum + part_ref[0, p]
    y = psum * inv_hw                                                # global mean
    # conv_du[0] + ReLU:  h[r] = relu(sum_c W1[r, c] * y[c] + b1[r])
    h = jnp.maximum(jnp.sum(w1t_ref[...] * y, axis=0, keepdims=True)
                    + b1_ref[...], 0.0)                              # (1, Cr)
    # conv_du[2] + Sigmoid:  s[c] = sigmoid(sum_r W2[c, r] * h[r] + b2[c])
    s = jax.nn.sigmoid(jnp.sum(w2_ref[...] * h, axis=1, keepdims=True)
                       + b2_ref[...])                                # (C, 1)
    # Multiply in the input dtype (s cast once per block) — avoids a full f32
    # copy of x; vs f32-multiply-then-cast this only re-rounds s per channel.
    o_ref[0] = x_ref[0] * s.astype(o_ref.dtype)


def _fused_kernel(x_ref, w1t_ref, b1_ref, w2_ref, b2_ref, o_ref, acc_ref,
                  *, inv_hw, hw, n_chunks, unroll):
    """Single pass per image when the whole (C, HW) slab fits comfortably."""
    acc_ref[...] = jnp.zeros_like(acc_ref)
    if n_chunks > 0:
        def body(k, carry):
            off = pl.multiple_of(k * 128, 128)
            acc_ref[...] += x_ref[0, :, pl.ds(off, 128)].astype(jnp.float32)
            return carry
        jax.lax.fori_loop(0, n_chunks, body, 0, unroll=unroll)
    y = jnp.sum(acc_ref[...], axis=1, keepdims=True)                 # (C, 1)
    rem = hw - n_chunks * 128
    if rem > 0:
        tail = x_ref[0, :, pl.ds(n_chunks * 128, rem)].astype(jnp.float32)
        y = y + jnp.sum(tail, axis=1, keepdims=True)
    y = y * inv_hw
    h = jnp.maximum(jnp.sum(w1t_ref[...] * y, axis=0, keepdims=True)
                    + b1_ref[...], 0.0)
    s = jax.nn.sigmoid(jnp.sum(w2_ref[...] * h, axis=1, keepdims=True)
                       + b2_ref[...])
    o_ref[0] = x_ref[0] * s.astype(o_ref.dtype)


# ---------------------------------------------------------------------------
# pallas_call wrappers
# ---------------------------------------------------------------------------

def _ca_pool(x, *, hw, tile, parts, s_total, vmem_limit):
    N, C, _ = x.shape
    assert s_total % parts == 0
    s_pp = s_total // parts
    n_chunks = tile // 128
    kernel = functools.partial(
        _pool_kernel, hw=hw, tile=tile, s_pp=s_pp, s_total=s_total,
        needs_mask=(hw % tile) != 0, n_chunks=n_chunks,
        unroll=max(1, min(8, n_chunks)))
    return pl.pallas_call(
        kernel,
        out_shape=jax.ShapeDtypeStruct((N, parts, C, 1), jnp.float32),
        grid_spec=pltpu.PrefetchScalarGridSpec(
            num_scalar_prefetch=0,
            grid=(N, parts, s_pp),
            in_specs=[pl.BlockSpec((1, C, tile),
                                   lambda n, p, s: (n, 0, p * s_pp + s))],
            out_specs=pl.BlockSpec((1, 1, C, 1), lambda n, p, s: (n, p, 0, 0)),
            scratch_shapes=[pltpu.VMEM((C, 128), jnp.float32)],
        ),
        compiler_params=pltpu.CompilerParams(
            dimension_semantics=("parallel", "parallel", "arbitrary"),
            vmem_limit_bytes=vmem_limit),
    )(x)


def _ca_excite(x, partial, w1t, b1, w2, b2, *, hw, tile, parts, s_total,
               vmem_limit):
    N, C, HW = x.shape
    Cr = w1t.shape[1]
    kernel = functools.partial(_excite_kernel, inv_hw=1.0 / hw, parts=parts)
    return pl.pallas_call(
        kernel,
        out_shape=jax.ShapeDtypeStruct((N, C, HW), x.dtype),
        grid_spec=pltpu.PrefetchScalarGridSpec(
            num_scalar_prefetch=0,
            grid=(N, s_total),
            in_specs=[
                pl.BlockSpec((1, parts, C, 1), lambda n, t: (n, 0, 0, 0)),
                pl.BlockSpec((C, Cr), lambda n, t: (0, 0)),
                pl.BlockSpec((1, Cr), lambda n, t: (0, 0)),
                pl.BlockSpec((C, Cr), lambda n, t: (0, 0)),
                pl.BlockSpec((C, 1), lambda n, t: (0, 0)),
                pl.BlockSpec((1, C, tile), lambda n, t: (n, 0, t)),
            ],
            out_specs=pl.BlockSpec((1, C, tile), lambda n, t: (n, 0, t)),
        ),
        compiler_params=pltpu.CompilerParams(
            dimension_semantics=("parallel", "parallel"),
            vmem_limit_bytes=vmem_limit),
    )(partial, w1t, b1, w2, b2, x)


def _ca_fused(x, w1t, b1, w2, b2, *, hw, vmem_limit):
    N, C, HW = x.shape
    Cr = w1t.shape[1]
    n_chunks = hw // 128
    kernel = functools.partial(_fused_kernel, inv_hw=1.0 / hw, hw=hw,
                               n_chunks=n_chunks,
                               unroll=max(1, min(8, n_chunks)))
    return pl.pallas_call(
        kernel,
        out_shape=jax.ShapeDtypeStruct((N, C, HW), x.dtype),
        grid_spec=pltpu.PrefetchScalarGridSpec(
            num_scalar_prefetch=0,
            grid=(N,),
            in_specs=[
                pl.BlockSpec((1, C, HW), lambda n: (n, 0, 0)),
                pl.BlockSpec((C, Cr), lambda n: (0, 0)),
                pl.BlockSpec((1, Cr), lambda n: (0, 0)),
                pl.BlockSpec((C, Cr), lambda n: (0, 0)),
                pl.BlockSpec((C, 1), lambda n: (0, 0)),
            ],
            out_specs=pl.BlockSpec((1, C, HW), lambda n: (n, 0, 0)),
            scratch_shapes=[pltpu.VMEM((C, 128), jnp.float32)],
        ),
        compiler_params=pltpu.CompilerParams(
            dimension_semantics=("parallel",),
            vmem_limit_bytes=vmem_limit),
    )(x, w1t, b1, w2, b2)


def ca_layer(x_nchw, w1, b1, w2, b2, *, mode="auto", spatial_tile=None):
    """CALayer forward.

    x_nchw : (N, C, H, W)
    w1     : (Cr, C)   -- PyTorch Conv2d(C, Cr, 1) weight (squeezed)
    b1     : (Cr,)
    w2     : (C, Cr)   -- PyTorch Conv2d(Cr, C, 1) weight (squeezed)
    b2     : (C,)
    """
    N, C, H, W = x_nchw.shape
    HW = H * W
    Cr = w1.shape[0]
    assert w1.shape == (Cr, C) and w2.shape == (C, Cr)

    x = x_nchw.reshape(N, C, HW)           # pure view, no HBM transpose

    f32 = jnp.float32
    w1t = jnp.asarray(w1, f32).T.reshape(C, Cr)   # (C, Cr) for sublane-reduce FC1
    b1r = jnp.asarray(b1, f32).reshape(1, Cr)
    w2m = jnp.asarray(w2, f32).reshape(C, Cr)     # native layout for lane-reduce FC2
    b2c = jnp.asarray(b2, f32).reshape(C, 1)

    vmem_limit, fused_gate, tile_target = _budgets()
    slab_bytes = C * HW * x.dtype.itemsize
    if mode == "auto":
        # Fused = 2x|x| HBM traffic, tiled = 3x|x|; prefer fused whenever one
        # image's slab fits the (generation-dependent) gate.  HW < 128 always
        # goes fused (spatial axis too narrow to tile lane-dense).
        mode = "fused" if (slab_bytes <= fused_gate or HW < 128) else "tiled"

    if mode == "fused":
        out = _ca_fused(x, w1t, b1r, w2m, b2c, hw=HW, vmem_limit=vmem_limit)
    else:
        tile = spatial_tile if spatial_tile is not None else _pick_spatial_tile(
            HW, C, x.dtype.itemsize, tile_target)
        assert tile % 128 == 0, "tiled path needs a 128-multiple spatial tile"
        s_total = pl.cdiv(HW, tile)
        # Batch==1 cannot occupy both v7x TensorCores through the batch axis:
        # split the pooling reduction into two "parallel" parts (per-part
        # partial sums combined in the excite pass).  No-op cost on 1-TC chips.
        parts = 2 if (N == 1 and s_total >= 2 and s_total % 2 == 0) else 1
        partial = _ca_pool(x, hw=HW, tile=tile, parts=parts, s_total=s_total,
                           vmem_limit=vmem_limit)
        out = _ca_excite(x, partial, w1t, b1r, w2m, b2c, hw=HW, tile=tile,
                         parts=parts, s_total=s_total, vmem_limit=vmem_limit)

    return out.reshape(N, C, H, W)


# ---------------------------------------------------------------------------
# Demo / self-test
# ---------------------------------------------------------------------------

def _reference(x, w1, b1, w2, b2):
    y = jnp.mean(x, axis=(2, 3))                          # (N, C)
    h = jnp.maximum(y @ w1.T + b1, 0.0)                   # (N, Cr)
    s = jax.nn.sigmoid(h @ w2.T + b2)                     # (N, C)
    return x * s[:, :, None, None]


if __name__ == "__main__":
    key = jax.random.PRNGKey(0)
    reduction = 4

    # Case A: N=2, C=8, 16x16 — exercises the fused path (auto) and the tiled
    # path (forced, 128-wide tiles, multi-tile reduction + lane-dense excite).
    N, C, H, W = 2, 8, 16, 16
    Cr = C // reduction
    kx, kw1, kb1, kw2, kb2, kx2 = jax.random.split(key, 6)
    x = jax.random.normal(kx, (N, C, H, W), dtype=jnp.float32)
    w1 = jax.random.normal(kw1, (Cr, C), dtype=jnp.float32) * 0.1
    b1 = jax.random.normal(kb1, (Cr,), dtype=jnp.float32) * 0.1
    w2 = jax.random.normal(kw2, (C, Cr), dtype=jnp.float32) * 0.1
    b2 = jax.random.normal(kb2, (C,), dtype=jnp.float32) * 0.1
    ref = _reference(x, w1, b1, w2, b2)

    out_auto = jax.block_until_ready(ca_layer(x, w1, b1, w2, b2))
    out_fused = jax.block_until_ready(ca_layer(x, w1, b1, w2, b2, mode="fused"))
    out_tiled = jax.block_until_ready(
        ca_layer(x, w1, b1, w2, b2, mode="tiled", spatial_tile=128))

    assert out_auto.shape == x.shape
    assert jnp.allclose(out_auto, ref, atol=1e-5, rtol=1e-5)
    assert jnp.allclose(out_fused, ref, atol=1e-5, rtol=1e-5)
    assert jnp.allclose(out_tiled, ref, atol=1e-5, rtol=1e-5)

    # Case B: N=1, C=8, 20x20 (HW=400, not a multiple of 128) — exercises the
    # masked-tail tiling and the 2-part parallel pooling split used for batch 1.
    N2, C2, H2, W2 = 1, 8, 20, 20
    x2 = jax.random.normal(kx2, (N2, C2, H2, W2), dtype=jnp.float32)
    ref2 = _reference(x2, w1, b1, w2, b2)
    out2 = jax.block_until_ready(
        ca_layer(x2, w1, b1, w2, b2, mode="tiled", spatial_tile=128))
    assert out2.shape == x2.shape
    assert jnp.allclose(out2, ref2, atol=1e-5, rtol=1e-5)

    print("KERNEL_OK")
</pallas_src>

<mosaic_0001>
module attributes {stable_mosaic.version = 11 : i64} {
  func.func @_fused_kernel(%arg0: i32, %arg1: memref<1x8x256xf32, #tpu.memory_space<vmem>>, %arg2: memref<8x2xf32, #tpu.memory_space<vmem>>, %arg3: memref<1x2xf32, #tpu.memory_space<vmem>>, %arg4: memref<8x2xf32, #tpu.memory_space<vmem>>, %arg5: memref<8x1xf32, #tpu.memory_space<vmem>>, %arg6: memref<1x8x256xf32, #tpu.memory_space<vmem>>, %arg7: memref<8x128xf32, #tpu.memory_space<vmem>>) attributes {dimension_semantics = [#tpu.dimension_semantics<parallel>], iteration_bounds = array<i64: 2>, scalar_prefetch = 0 : i64, scratch_operands = 1 : i64, tpu.core_type = #tpu.core_type<tc>, window_params = [{transform_indices = @transform_0, window_bounds = array<i64: 1, 8, 256>}, {pipeline_mode = #tpu.pipeline_mode<synchronous>, transform_indices = @transform_1, window_bounds = array<i64: 8, 2>}, {pipeline_mode = #tpu.pipeline_mode<synchronous>, transform_indices = @transform_2, window_bounds = array<i64: 1, 2>}, {pipeline_mode = #tpu.pipeline_mode<synchronous>, transform_indices = @transform_3, window_bounds = array<i64: 8, 2>}, {pipeline_mode = #tpu.pipeline_mode<synchronous>, transform_indices = @transform_4, window_bounds = array<i64: 8, 1>}, {transform_indices = @transform_5, window_bounds = array<i64: 1, 8, 256>}]} {
    %cst = arith.constant 0.000000e+00 : f32
    %0 = vector.broadcast %cst : f32 to vector<8x128xf32>
    %c0 = arith.constant 0 : index
    %c0_0 = arith.constant 0 : index
    %1 = vector.load %arg7[%c0, %c0_0] : memref<8x128xf32, #tpu.memory_space<vmem>>, vector<8x128xf32>
    tpu.vector_store %arg7[%c0, %c0_0], %0 {strides = array<i32>} : memref<8x128xf32, #tpu.memory_space<vmem>>, vector<8x128xf32>,
    %c0_i32 = arith.constant 0 : i32
    %c128_i32 = arith.constant 128 : i32
    %2 = arith.muli %c0_i32, %c128_i32 : i32
    %3 = tpu.assume_multiple %2, 128 : i32
    %c0_1 = arith.constant 0 : index
    %c0_2 = arith.constant 0 : index
    %4 = vector.load %arg7[%c0_1, %c0_2] : memref<8x128xf32, #tpu.memory_space<vmem>>, vector<8x128xf32>
    %c0_3 = arith.constant 0 : index
    %c0_4 = arith.constant 0 : index
    %5 = arith.index_cast %3 : i32 to index
    %6 = vector.load %arg1[%c0_3, %c0_4, %5] : memref<1x8x256xf32, #tpu.memory_space<vmem>>, vector<1x8x128xf32>
    %7 = vector.shape_cast %6 : vector<1x8x128xf32> to vector<8x128xf32>
    %8 = arith.addf %4, %7 : vector<8x128xf32>
    %c0_5 = arith.constant 0 : index
    %c0_6 = arith.constant 0 : index
    %9 = vector.load %arg7[%c0_5, %c0_6] : memref<8x128xf32, #tpu.memory_space<vmem>>, vector<8x128xf32>
    tpu.vector_store %arg7[%c0_5, %c0_6], %8 {strides = array<i32>} : memref<8x128xf32, #tpu.memory_space<vmem>>, vector<8x128xf32>,
    %c1_i32 = arith.constant 1 : i32
    %c128_i32_7 = arith.constant 128 : i32
    %10 = arith.muli %c1_i32, %c128_i32_7 : i32
    %11 = tpu.assume_multiple %10, 128 : i32
    %c0_8 = arith.constant 0 : index
    %c0_9 = arith.constant 0 : index
    %12 = vector.load %arg7[%c0_8, %c0_9] : memref<8x128xf32, #tpu.memory_space<vmem>>, vector<8x128xf32>
    %c0_10 = arith.constant 0 : index
    %c0_11 = arith.constant 0 : index
    %13 = arith.index_cast %11 : i32 to index
    %14 = vector.load %arg1[%c0_10, %c0_11, %13] : memref<1x8x256xf32, #tpu.memory_space<vmem>>, vector<1x8x128xf32>
    %15 = vector.shape_cast %14 : vector<1x8x128xf32> to vector<8x128xf32>
    %16 = arith.addf %12, %15 : vector<8x128xf32>
    %c0_12 = arith.constant 0 : index
    %c0_13 = arith.constant 0 : index
    %17 = vector.load %arg7[%c0_12, %c0_13] : memref<8x128xf32, #tpu.memory_space<vmem>>, vector<8x128xf32>
    tpu.vector_store %arg7[%c0_12, %c0_13], %16 {strides = array<i32>} : memref<8x128xf32, #tpu.memory_space<vmem>>, vector<8x128xf32>,
    %c2_i32 = arith.constant 2 : i32
    %c0_14 = arith.constant 0 : index
    %c0_15 = arith.constant 0 : index
    %18 = vector.load %arg7[%c0_14, %c0_15] : memref<8x128xf32, #tpu.memory_space<vmem>>, vector<8x128xf32>
    %cst_16 = arith.constant dense<0.000000e+00> : vector<8xf32>
    %19 = vector.multi_reduction <add>, %18, %cst_16 [1] : vector<8x128xf32> to vector<8xf32>
    %20 = vector.shape_cast %19 : vector<8xf32> to vector<8x1xf32>
    %cst_17 = arith.constant 3.906250e-03 : f32
    %21 = vector.broadcast %cst_17 : f32 to vector<8x1xf32>
    %22 = arith.mulf %20, %21 : vector<8x1xf32>
    %c0_18 = arith.constant 0 : index
    %c0_19 = arith.constant 0 : index
    %23 = vector.load %arg2[%c0_18, %c0_19] : memref<8x2xf32, #tpu.memory_space<vmem>>, vector<8x2xf32>
    %24 = vector.broadcast %22 : vector<8x1xf32> to vector<8x2xf32>
    %25 = arith.mulf %23, %24 : vector<8x2xf32>
    %cst_20 = arith.constant dense<0.000000e+00> : vector<2xf32>
    %26 = vector.multi_reduction <add>, %25, %cst_20 [0] : vector<8x2xf32> to vector<2xf32>
    %27 = vector.shape_cast %26 : vector<2xf32> to vector<1x2xf32>
    %c0_21 = arith.constant 0 : index
    %c0_22 = arith.constant 0 : index
    %28 = vector.load %arg3[%c0_21, %c0_22] : memref<1x2xf32, #tpu.memory_space<vmem>>, vector<1x2xf32>
    %29 = arith.addf %27, %28 : vector<1x2xf32>
    %cst_23 = arith.constant 0.000000e+00 : f32
    %30 = vector.broadcast %cst_23 : f32 to vector<1x2xf32>
    %31 = arith.maximumf %29, %30 : vector<1x2xf32>
    %c0_24 = arith.constant 0 : index
    %c0_25 = arith.constant 0 : index
    %32 = vector.load %arg4[%c0_24, %c0_25] : memref<8x2xf32, #tpu.memory_space<vmem>>, vector<8x2xf32>
    %33 = vector.broadcast %31 : vector<1x2xf32> to vector<8x2xf32>
    %34 = arith.mulf %32, %33 : vector<8x2xf32>
    %cst_26 = arith.constant dense<0.000000e+00> : vector<8xf32>
    %35 = vector.multi_reduction <add>, %34, %cst_26 [1] : vector<8x2xf32> to vector<8xf32>
    %36 = vector.shape_cast %35 : vector<8xf32> to vector<8x1xf32>
    %c0_27 = arith.constant 0 : index
    %c0_28 = arith.constant 0 : index
    %37 = vector.load %arg5[%c0_27, %c0_28] : memref<8x1xf32, #tpu.memory_space<vmem>>, vector<8x1xf32>
    %38 = arith.addf %36, %37 : vector<8x1xf32>
    %39 = arith.negf %38 : vector<8x1xf32>
    %40 = math.exp %39 : vector<8x1xf32>
    %cst_29 = arith.constant 1.000000e+00 : f32
    %41 = vector.broadcast %cst_29 : f32 to vector<8x1xf32>
    %42 = arith.addf %41, %40 : vector<8x1xf32>
    %43 = arith.divf %41, %42 : vector<8x1xf32>
    %c0_30 = arith.constant 0 : index
    %c0_31 = arith.constant 0 : index
    %c0_32 = arith.constant 0 : index
    %44 = vector.load %arg1[%c0_30, %c0_31, %c0_32] : memref<1x8x256xf32, #tpu.memory_space<vmem>>, vector<1x8x256xf32>
    %45 = vector.shape_cast %44 : vector<1x8x256xf32> to vector<8x256xf32>
    %46 = vector.broadcast %43 : vector<8x1xf32> to vector<8x256xf32>
    %47 = arith.mulf %45, %46 : vector<8x256xf32>
    %c0_33 = arith.constant 0 : index
    %c0_34 = arith.constant 0 : index
    %c0_35 = arith.constant 0 : index
    %48 = vector.load %arg6[%c0_33, %c0_34, %c0_35] : memref<1x8x256xf32, #tpu.memory_space<vmem>>, vector<1x8x256xf32>
    %49 = vector.shape_cast %48 : vector<1x8x256xf32> to vector<8x256xf32>
    %50 = vector.shape_cast %47 : vector<8x256xf32> to vector<1x8x256xf32>
    tpu.vector_store %arg6[%c0_33, %c0_34, %c0_35], %50 {strides = array<i32>} : memref<1x8x256xf32, #tpu.memory_space<vmem>>, vector<1x8x256xf32>,
    return
  }
  func.func @transform_0(%arg0: i32) -> (i32, i32, i32) {
    %c0_i32 = arith.constant 0 : i32
    %c0_i32_0 = arith.constant 0 : i32
    %c0_i32_1 = arith.constant 0 : i32
    return %arg0, %c0_i32, %c0_i32_0 : i32, i32, i32
  }
  func.func @transform_1(%arg0: i32) -> (i32, i32) {
    %c0_i32 = arith.constant 0 : i32
    %c0_i32_0 = arith.constant 0 : i32
    %c0_i32_1 = arith.constant 0 : i32
    return %c0_i32, %c0_i32_0 : i32, i32
  }
  func.func @transform_2(%arg0: i32) -> (i32, i32) {
    %c0_i32 = arith.constant 0 : i32
    %c0_i32_0 = arith.constant 0 : i32
    %c0_i32_1 = arith.constant 0 : i32
    return %c0_i32, %c0_i32_0 : i32, i32
  }
  func.func @transform_3(%arg0: i32) -> (i32, i32) {
    %c0_i32 = arith.constant 0 : i32
    %c0_i32_0 = arith.constant 0 : i32
    %c0_i32_1 = arith.constant 0 : i32
    return %c0_i32, %c0_i32_0 : i32, i32
  }
  func.func @transform_4(%arg0: i32) -> (i32, i32) {
    %c0_i32 = arith.constant 0 : i32
    %c0_i32_0 = arith.constant 0 : i32
    %c0_i32_1 = arith.constant 0 : i32
    return %c0_i32, %c0_i32_0 : i32, i32
  }
  func.func @transform_5(%arg0: i32) -> (i32, i32, i32) {
    %c0_i32 = arith.constant 0 : i32
    %c0_i32_0 = arith.constant 0 : i32
    %c0_i32_1 = arith.constant 0 : i32
    return %arg0, %c0_i32, %c0_i32_0 : i32, i32, i32
  }
}

</mosaic_0001>

<bundles_post_ra>
// kernel: tpu_custom_call.1
= control target key start
LH: loop header
LB: loop body
LE: loop exit
PB: predicated region body
PF: predicated region fallthrough
CT: control target
= control target key end

     0   :  { %10 = vsyncpa [#allocation4], 0  ;;  %s744_s0 = inlined_call_operand.hbm [shape: f32[2,8,256], index: 0, kind: input, shape index: {}]   ;;  %s745_s1 = inlined_call_operand.vmem [shape: f32[8,2], index: 1, kind: input, shape index: {}]   ;;  %s746_s2 = inlined_call_operand.vmem [shape: f32[1,2], index: 2, kind: input, shape index: {}]   ;;  %s747_s3 = inlined_call_operand.vmem [shape: f32[8,2], index: 3, kind: input, shape index: {}]   ;;  %s748_s4 = inlined_call_operand.vmem [shape: f32[8,1], index: 4, kind: input, shape index: {}]   ;;  %s749_s5 = inlined_call_operand.hbm [shape: f32[2,8,256], index: 5, kind: output, shape index: {}]  }
   0x1   :  { %12 = vsyncpa [#allocation4 + $0x1], 0 }
   0x2   :  { %13 = vsyncpa [#allocation5], 0 }
   0x3   :  { %15 = vsyncpa [#allocation5 + $0x1], 0  ;;  %s579_s18 = smov 0   ;;  %s581_s19 = smov 0  }
   0x4   :  { %s583_s20 = smov 0   ;;  %s585_s21 = smov 0  }
   0x5 LB: > { %s600_s22 = sadd.s32 4294967295, %s544_s21   ;;  %s381_s23 = sadd.s32 4294967294, %s544_s21   ;;  %s544_s21 = sphi %s585_s21, %s766_s21   ;;  %s540_s20 = sphi %s583_s20, %s765_s20   ;;  %s536_s19 = sphi %s581_s19, %s764_s19   ;;  %s532_s18 = sphi %s579_s18, %s763_s18  }
   0x6   : > { %s604_s24 = sadd.s32 1, %s544_s21   ;;  %s28_s25 = sadd.s32 1, %s540_s20 }
   0x7   : > { %s25_s26 = ssub.s32 %s544_s21, %s604_s24  ;;  %p35_p0 = scmp.ne.s32.totalorder %s540_s20, %s536_s19 }
   0x8   : > { %p26_p1 = scmp.eq.s32.totalorder %s25_s26, 0  ;;  %p36_p2 = scmp.eq.s32.totalorder %s544_s21, 0 }
   0x9   : > { %p41_p3 = scmp.ne.s32.totalorder %s536_s19, %s532_s18  ;;  %p42_p4 = scmp.eq.s32.totalorder %s600_s22, 0 }
   0xa   : > { %s616_s27 = scalar_select %p26_p1, %s540_s20, %s28_s25  }
   0xb   : > { %p618_p5 = por %p36_p2, %p35_p0  ;;  %p622_p6 = por %p42_p4, %p41_p3 }
   0xc   : > { %p149_p7 = scmp.eq.s32.totalorder %s600_s22, 1  ;;  %p155_p8 = scmp.eq.s32.totalorder %s381_s23, 1 }
   0xd   : > { %s753_s29 = scalar_select %p622_p6, 1, 0 }
   0xe   : > { %p411_p10 = scmp.lt.s32.totalorder %s544_s21, 2  ;;  %p629_p11 = por %p149_p7, %p35_p0 }
   0xf   : > { %p633_p12 = por %p155_p8, %p41_p3  ;;  %s187_s7 = sand.u32 1, %s540_s20  }
  0x10   : > { %s754_s30 = scalar_select %p629_p11, 1, 0 }
  0x11   : > { %s755_s6 = scalar_select %p633_p12, 1, 0 }
  0x12   : > { %s397_s8 = sshll.u32 %s544_s21, 8  ;;  %s384_s9 = sshll.u32 %s187_s7, 4 }
  0x13   : > { %s642_s12 = scalar_lea.hbm %s744_s0, %s397_s8  ;;  %s191_s13 = scalar_lea.vmem [#allocation3], %s384_s9 }
  0x14   : > { %s199_s14 = sshll.u32 %s191_s13, 4  ;;  %p646_p13 = pnand %p411_p10, %p618_p5  ;;  %s650_s14 = int_to_ptr.vmem [resolvable:$true] %s199_s14 }
  0x15   : > { %s188_s16 = scalar_lea.sflag [#allocation4], %s187_s7  ;;  %s452_s17 = scalar_lea.hbm %s642_s12, 256 }
  0x16   : > { %p453_p2 = scmp.ne.s32.totalorder %s642_s12, %s452_s17  ;;  %p454_p3 = pneg %p646_p13 }
  0x17   : > { %s457_s26 = scalar_lea.hbm %s744_s0, 512  ;;  %p458_p5 = scmp.lt.s32.totalorder %s642_s12, %s744_s0 }
  0x18   : > { %p455_p4 = pnand %p454_p3, %p453_p2  ;;  %p459_p8 = scmp.lt.s32.totalorder %s457_s26, %s452_s17 }
  0x1a   : > { %p456_p7 = pneg %p455_p4  ;;  %p460_p10 = por %p459_p8, %p458_p5 }
  0x1c   : > { %p461_p9 = pnand %p460_p10, %p456_p7 }
  0x1e   : > { %464 = shalt.err (!%p461_p9)
}
  0x1f   : > { %s465_s7 = scalar_lea.vmem %s650_s14, 256  ;;  %s546_s9 = smov [#allocation3]  }
  0x20   : > { %p466_p0 = scmp.ne.s32.totalorder %s650_s14, %s465_s7  ;;  %s470_s10 = sshll.u32 %s546_s9, 4  ;;  %s471_s10 = int_to_ptr.vmem [resolvable:$false] %s470_s10 }
  0x21   : > { %s472_s11 = scalar_lea.vmem %s471_s10, 512  ;;  %p473_p4 = scmp.lt.s32.totalorder %s650_s14, %s471_s10 }
  0x22   : > { %p468_p1 = pnand %p466_p0, %p454_p3  ;;  %p474_p12 = scmp.lt.s32.totalorder %s472_s11, %s465_s7 }
  0x24   : > { %p469_p2 = pneg %p468_p1  ;;  %p475_p11 = por %p474_p12, %p473_p4 }
  0x26   : > { %p476_p6 = pnand %p475_p11, %p469_p2 }
  0x28   : > { %479 = shalt.err (!%p476_p6)
}
  0x29   : > { %406 = dma.hbm_to_vmem [thread:$0]  (!%p646_p13), %s642_s12, 256, %s650_s14, %s188_s16  }
  0x2a   : > { %p757_p9 = scmp.lt.s32.totalorder %s544_s21, 3  ;;  %p758_p7 = scmp.ge.s32.totalorder %s544_s21, 1 }
  0x2c   : > { %p205_p0 = pnand %p758_p7, %p757_p9 }
  0x2d   : > { %s677_s13 = sand.u32 (!%p205_p0), 1, %s536_s19   ;;  %p759_p6 = scmp.ne.s32.totalorder (!%p205_p0), %s753_s29, 0 }
  0x2e   : > { %208 = sbr.rel (%p205_p0) target bundleno = 530 (0x212), region = 40  ;;  %s388_s17 = sshll.u32 (!%p205_p0), %s677_s13, 4 }
  0x2f   : > { %s211_s23 = scalar_lea.sflag (!%p205_p0), [#allocation4], %s677_s13  ;;  %s214_s15 = scalar_lea.vmem (!%p205_p0), [#allocation3], %s388_s17 }
  0x33   : > { %523 = dma.done.wait (%p759_p6), %s211_s23, 256  }
  0x34   : > { %525 = vsyncadd (%p759_p6), %s211_s23, 4294967040  ;;  %v243_v0 = vld [vmem:[%s214_s15] sm:$0xff]  ;;  %v390_v1 = vld [vmem:[%s214_s15 + $0x8] sm:$0xff]  ;;  %vm257_vm0 = vcmask 15360   ;;  %v269_v11 = vlaneseq  ;;  %v547_v24 = vmov 0   ;;  %s398_s7 = sshll.u32 %s600_s22, 8 }
  0x35   : > { %v249_v2 = vadd.f32 %v390_v1, %v243_v0  ;;  %v255_v3 = vld [vmem:[%s745_s1] sm:$0xff]  ;;  %446 = vset.pattern.permute.xlu1 %v547_v24  ;;  %447 = vset.pattern.permute.xlu0 %v547_v24  ;;  %s240_s9 = scalar_lea.vmem [#allocation6], %s388_s17  ;;  %s707_s15 = scalar_lea.hbm %s749_s5, %s398_s7 }
  0x36   : > { %v270_v14 = vshrl.u32 %v269_v11, 7  ;;  %v265_v15 = vld [vmem:[%s746_s2] sm:$0x1]  ;;  %s311_s10 = sshll.u32 %s240_s9, 4  ;;  %s297_s12 = scalar_lea.sflag [#allocation5], %s677_s13  ;;  %s312_s10 = int_to_ptr.vmem [resolvable:$true] %s311_s10 }
  0x37   : > { %252 = vadd.xlane.f32.xlu0 %v249_v2  ;;  %v268_v20 = vld [vmem:[%s747_s3] sm:$0xff]  ;;  %s480_s14 = scalar_lea.vmem %s312_s10, 256  ;;  %p760_p12 = scmp.ne.s32.totalorder %s754_s30, 0 }
  0x38   : > { %v271_v18 = vsub.s32 0, %v270_v14  ;;  %v277_v25 = vld [vmem:[%s748_s4] sm:$0xff]  ;;  %p481_p11 = scmp.ne.s32.totalorder %s312_s10, %s480_s14  ;;  %s548_s22 = smov [#allocation6]  }
  0x39   : > { %s484_s17 = sshll.u32 %s548_s22, 4  ;;  %s485_s17 = int_to_ptr.vmem [resolvable:$false] %s484_s17 }
  0x3a   : > { %p482_p13 = pnand %p481_p11, %p760_p12  ;;  %s486_s29 = scalar_lea.vmem %s485_s17, 512 }
  0x3b   : > { %p487_p3 = scmp.lt.s32.totalorder %s312_s10, %s485_s17  ;;  %p488_p5 = scmp.lt.s32.totalorder %s486_s29, %s480_s14 }
  0x3c   : > { %p483_p1 = pneg %p482_p13 }
  0x3d   : > { %p489_p8 = por %p488_p5, %p487_p3 }
  0x3f   : > { %p490_p10 = pnand %p489_p8, %p483_p1 }
  0xc0   : > { %v253_v4 = vpop.xlane.xlu0 %252 }
  0xc1   : > { %v254_v5 = vmul.f32 0.00390625, %v253_v4 }
  0xc3   : > { %v256_v6 = vmul.f32 %v255_v3, %v254_v5 }
  0xc5   : > { %v258_v7 = vsel %vm257_vm0, %v256_v6, 0.0 }
  0xc6   : > { %v259_v8 = vrot.slane %v258_v7, 4 }
  0xc8   : > { %v260_v9 = vadd.f32 %v259_v8, %v258_v7 }
  0xca   : > { %v261_v10 = vrot.slane %v260_v9, 2 }
  0xcc   : > { %v262_v12 = vadd.f32 %v261_v10, %v260_v9 }
  0xce   : > { %v263_v13 = vrot.slane %v262_v12, 1 }
  0xd0   : > { %v264_v16 = vadd.f32 %v263_v13, %v262_v12 }
  0xd2   : > { %v266_v17 = vadd.f32 %v265_v15, %v264_v16 }
  0xd4   : > { %v267_v19 = vmax.f32 %v266_v17, 0.0 }
  0xd6   : > { %v272_v21 = vrot.slane %v267_v19, %v271_v18 }
  0xd8   : > { %v273_v22 = vmul.f32 %v272_v21, %v268_v20 }
  0xda   : > { %v274_v23 = vsel %vm257_vm0, %v273_v22, 0.0 }
  0xdb   : > { %275 = vadd.xlane.f32.xlu0 %v274_v23 }
 0x164   : > { %v276_v26 = vpop.xlane.xlu0 %275 }
 0x165   : > { %v278_v27 = vadd.f32 %v277_v25, %v276_v26 }
 0x167   : > { %v391_v28 = vmul.f32 -1.442695, %v278_v27 }
 0x169   : > { %448 = vpow2.f32 %v391_v28 }
 0x176   : > { %v449_v29 = vpop.eup %448 }
 0x177   : > { %v282_v30 = vadd.f32 1.0, %v449_v29 }
 0x179   : > { %450 = vrcp.f32 %v282_v30 }
 0x186   : > { %v451_v31 = vpop.eup %450 }
 0x187   : > { %289 = vperm.xlu1 %446, %v451_v31  }
 0x202   : > { %v290_v32 = vpop.permute.xlu1 %289 }
 0x203   : > { %v292_v33 = vmul.f32 %v290_v32, %v243_v0  ;;  %v293_v34 = vmul.f32 %v390_v1, %v290_v32 }
 0x205   : > { %294 = vst [vmem:[%s240_s9] sm:$0xff] %v292_v33  ;;  %295 = vst [vmem:[%s240_s9 + $0x8] sm:$0xff] %v293_v34 }
 0x206   : > { %493 = shalt.err (!%p490_p10)
}
 0x207   : > { %s494_s16 = scalar_lea.hbm %s707_s15, 256  ;;  %s498_s26 = scalar_lea.hbm %s749_s5, 512 }
 0x208   : > { %p495_p2 = scmp.ne.s32.totalorder %s707_s15, %s494_s16  ;;  %p499_p7 = scmp.lt.s32.totalorder %s707_s15, %s749_s5 }
 0x209   : > { %p500_p0 = scmp.lt.s32.totalorder %s498_s26, %s494_s16 }
 0x20a   : > { %p496_p4 = pnand %p495_p2, %p760_p12 }
 0x20b   : > { %p501_p6 = por %p500_p0, %p499_p7 }
 0x20c   : > { %p497_p9 = pneg %p496_p4 }
 0x20e   : > { %p502_p11 = pnand %p501_p6, %p497_p9 }
 0x210   : > { %505 = shalt.err (!%p502_p11)
}
 0x211   : > { %401 = dma.vmem_to_hbm [thread:$0]  (%p760_p12), %s312_s10, 256, %s707_s15, %s297_s12  }
 0x212 PF: > { %s323_s7 = sand.u32 1, %s532_s18   ;;  %p761_p13 = scmp.ne.s32.totalorder %s755_s6, 0 }
 0x213   : > { %p762_p1 = scmp.ge.s32.totalorder %s544_s21, 2  ;;  %s324_s9 = scalar_lea.sflag [#allocation5], %s323_s7 }
 0x215   : > { %p408_p3 = pnand %p762_p1, %p761_p13 }
 0x217   : > { %p409_p5 = pneg %p408_p3 }
 0x219   : > { %527 = dma.done.wait (%p409_p5), %s324_s9, 256  }
 0x21a   : > { %529 = vsyncadd (%p409_p5), %s324_s9, 4294967040  ;;  %p18_p8 = scmp.ge.s32.totalorder %s604_s24, 4   ;;  %s763_s18 = smov %s536_s19 }
 0x21b   : > { %s764_s19 = smov %s540_s20  ;;  %s765_s20 = smov %s616_s27 }
 0x21c   : > { %s766_s21 = smov %s604_s24  ;;  %20 = sbr.rel (!%p18_p8) target bundleno = 5 (0x5), region = 86 }
 0x221   :  { %329 = vsyncpa [#allocation4], 1 }
 0x222   :  { %331 = vsyncpa [#allocation4 + $0x1], 1 }
 0x223   :  { %332 = vsyncpa [#allocation5], 1 }
 0x224   :  { %334 = vsyncpa [#allocation5 + $0x1], 1 }

</bundles_post_ra>
